<compile_context>
chip_gen: v6e
topology: v6e:2x2x1
jax: 0.10.0
libtpu: 0.0.40
codegen_flags: <defaults>
</compile_context>

<pallas_src>
import jax
import jax.numpy as jnp
from jax.experimental import pallas as pl
from jax.experimental.pallas import tpu as pltpu


_SUBLANE = 8
_LANE = 128
_PARAM_TILE_BYTES = 2 * 1024 * 1024   # per-step param block budget
_OUT_TILE_BYTES = 4 * 1024 * 1024     # per-step output block budget


def _broadcast_copy_kernel(param_ref, out_ref):
    # param_ref: (r_t, lanes) tile of the flattened constant (VMEM)
    # out_ref:   (B_t, r_t, lanes) tile of the output (VMEM)
    out_ref[...] = jnp.broadcast_to(param_ref[...][None, :, :], out_ref.shape)


def _round_up(n, m):
    return ((n + m - 1) // m) * m


def _pick_lanes(n_pad):
    """n_pad is a multiple of 1024; pick the widest power-of-two lane extent that keeps
    rows = n_pad // lanes a multiple of 8 (so row tiling stays legal)."""
    for lanes in (1024, 512, 256):
        if n_pad % (_SUBLANE * lanes) == 0:
            return lanes
    return _LANE


def _largest_div_mult8(n, cap):
    """n is a multiple of 8; largest divisor of n that is a multiple of 8 and <= cap."""
    cap = max(_SUBLANE, min(n, cap))
    best = _SUBLANE
    d = _SUBLANE
    while d <= cap:
        if n % d == 0:
            best = d
        d += _SUBLANE
    return best


def _largest_div(n, cap):
    cap = max(1, min(n, cap))
    for d in range(cap, 0, -1):
        if n % d == 0:
            return d
    return 1


def constant_input(param, x):
    """Pallas implementation of ConstantInput.forward.

    param : (1, C, H, W) learned constant (nn.Parameter(torch.randn(1, channel, size, size)))
    x     : any array; only x.shape[0] (batch) is used, exactly like the PyTorch module.
    returns (B, C, H, W) == param repeated along the batch dim.
    """
    batch = x.shape[0]
    _, C, H, W = param.shape
    dtype = param.dtype
    if batch == 0:
        return jnp.zeros((0, C, H, W), dtype=dtype)

    itemsize = jnp.dtype(dtype).itemsize
    n = C * H * W
    n_pad = _round_up(n, _SUBLANE * _LANE)   # lane-dense + 8-divisible rows, always

    lanes = _pick_lanes(n_pad)
    rows = n_pad // lanes                    # multiple of 8 by construction
    row_bytes = lanes * itemsize

    # Param (input) tile: <= ~2 MiB.
    r_t = _largest_div_mult8(rows, _PARAM_TILE_BYTES // row_bytes)
    # Fold as much of the batch as fits in a ~4 MiB output block (batch in the block,
    # not the grid -> ~B x fewer grid steps for this memcpy).
    b_t = _largest_div(batch, max(1, _OUT_TILE_BYTES // (r_t * row_bytes)))

    # v7x: if we collapsed to a single step but the copy is non-trivial, split the batch
    # in two so both TensorCores get a grid step.
    if ((rows // r_t) * (batch // b_t) == 1 and batch % 2 == 0
            and batch * rows * row_bytes >= (1 << 20)):
        b_t = batch // 2

    n_row_tiles = rows // r_t
    n_batch_tiles = batch // b_t

    p_flat = param.reshape(-1)
    if n_pad != n:
        p_flat = jnp.pad(p_flat, (0, n_pad - n))
    p2d = p_flat.reshape(rows, lanes)

    in_block_bytes = r_t * row_bytes
    out_block_bytes = b_t * r_t * row_bytes
    # Cover double-buffered in+out blocks with headroom; stays well under every chip's VMEM.
    vmem_limit = int(min(64 << 20, max(8 << 20, 4 * (in_block_bytes + out_block_bytes))))

    out3d = pl.pallas_call(
        _broadcast_copy_kernel,
        out_shape=jax.ShapeDtypeStruct((batch, rows, lanes), dtype),
        grid=(n_row_tiles, n_batch_tiles),   # batch innermost: param tile reused, no re-DMA
        in_specs=[pl.BlockSpec((r_t, lanes), lambda s, b: (s, 0))],
        out_specs=pl.BlockSpec((b_t, r_t, lanes), lambda s, b: (b, s, 0)),
        compiler_params=pltpu.CompilerParams(
            dimension_semantics=("parallel", "parallel"),
            vmem_limit_bytes=vmem_limit,
        ),
        cost_estimate=pl.CostEstimate(
            flops=0,
            transcendentals=0,
            bytes_accessed=(n_pad + batch * n_pad) * itemsize,
        ),
    )(p2d)

    out_flat = out3d.reshape(batch, n_pad)
    if n_pad != n:
        out_flat = out_flat[:, :n]
    return out_flat.reshape(batch, C, H, W)


if __name__ == "__main__":
    key = jax.random.PRNGKey(0)
    k1, k2, k3, k4, k5, k6 = jax.random.split(key, 6)

    # 1) Module-default small geometry: ConstantInput(channel=4, size=4), batch=2.
    B, C, size = 2, 4, 4
    param = jax.random.normal(k1, (1, C, size, size), dtype=jnp.float32)
    x = jax.random.normal(k2, (B, 32), dtype=jnp.float32)  # style latent; only batch is used
    out = constant_input(param, x)
    jax.block_until_ready(out)
    ref = jnp.tile(param, (B, 1, 1, 1))
    assert out.shape == ref.shape and jnp.array_equal(out, ref)

    # 2) Lane-dense case without padding (C*H*W = 2048): channel=8, size=16, batch=3.
    B2, C2, size2 = 3, 8, 16
    param2 = jax.random.normal(k3, (1, C2, size2, size2), dtype=jnp.float32)
    x2 = jax.random.normal(k4, (B2, 32), dtype=jnp.float32)
    out2 = constant_input(param2, x2)
    jax.block_until_ready(out2)
    ref2 = jnp.tile(param2, (B2, 1, 1, 1))
    assert out2.shape == ref2.shape and jnp.array_equal(out2, ref2)

    # 3) Awkward shape exercising the pad/slice path (C*H*W = 75): channel=3, size=5, batch=2.
    B3, C3, size3 = 2, 3, 5
    param3 = jax.random.normal(k5, (1, C3, size3, size3), dtype=jnp.float32)
    x3 = jax.random.normal(k6, (B3, 32), dtype=jnp.float32)
    out3 = constant_input(param3, x3)
    jax.block_until_ready(out3)
    ref3 = jnp.tile(param3, (B3, 1, 1, 1))
    assert out3.shape == ref3.shape and jnp.array_equal(out3, ref3)

    print("KERNEL_OK")
</pallas_src>

<mosaic_0001>
module attributes {stable_mosaic.version = 11 : i64} {
  func.func @_broadcast_copy_kernel(%arg0: i32, %arg1: i32, %arg2: memref<8x128xf32, #tpu.memory_space<vmem>>, %arg3: memref<2x8x128xf32, #tpu.memory_space<vmem>>) attributes {dimension_semantics = [#tpu.dimension_semantics<parallel>, #tpu.dimension_semantics<parallel>], iteration_bounds = array<i64: 1, 1>, scalar_prefetch = 0 : i64, scratch_operands = 0 : i64, tpu.core_type = #tpu.core_type<tc>, window_params = [{transform_indices = @transform_0, window_bounds = array<i64: 8, 128>}, {transform_indices = @transform_1, window_bounds = array<i64: 2, 8, 128>}]} {
    %c0 = arith.constant 0 : index
    %c0_0 = arith.constant 0 : index
    %0 = vector.load %arg2[%c0, %c0_0] : memref<8x128xf32, #tpu.memory_space<vmem>>, vector<8x128xf32>
    %1 = vector.shape_cast %0 : vector<8x128xf32> to vector<1x8x128xf32>
    %2 = vector.shape_cast %1 : vector<1x8x128xf32> to vector<1x8x128xf32>
    %3 = vector.broadcast %2 : vector<1x8x128xf32> to vector<2x8x128xf32>
    %c0_1 = arith.constant 0 : index
    %c0_2 = arith.constant 0 : index
    %c0_3 = arith.constant 0 : index
    %4 = vector.load %arg3[%c0_1, %c0_2, %c0_3] : memref<2x8x128xf32, #tpu.memory_space<vmem>>, vector<2x8x128xf32>
    tpu.vector_store %arg3[%c0_1, %c0_2, %c0_3], %3 {strides = array<i32>} : memref<2x8x128xf32, #tpu.memory_space<vmem>>, vector<2x8x128xf32>,
    return
  }
  func.func @transform_0(%arg0: i32, %arg1: i32) -> (i32, i32) {
    %c0_i32 = arith.constant 0 : i32
    %c0_i32_0 = arith.constant 0 : i32
    return %arg0, %c0_i32 : i32, i32
  }
  func.func @transform_1(%arg0: i32, %arg1: i32) -> (i32, i32, i32) {
    %c0_i32 = arith.constant 0 : i32
    %c0_i32_0 = arith.constant 0 : i32
    return %arg1, %arg0, %c0_i32 : i32, i32, i32
  }
}

</mosaic_0001>

<bundles_post_ra>
// kernel: tpu_custom_call.1
= control target key start
LH: loop header
LB: loop body
LE: loop exit
PB: predicated region body
PF: predicated region fallthrough
CT: control target
= control target key end

     0   :  { %6 = vsyncpa [#allocation3], 0  ;;  %s109_s0 = inlined_call_operand.hbm [shape: f32[8,128], index: 0, kind: input, shape index: {}]   ;;  %s110_s1 = inlined_call_operand.hbm [shape: f32[2,8,128], index: 1, kind: output, shape index: {}]  }
   0x1   :  { %7 = vsyncpa [#allocation4], 0  ;;  %s89_s6 = smov [#allocation2]  }
   0x2   :  { %s14_s7 = sshll.u32 %s89_s6, 4  ;;  %s15_s7 = int_to_ptr.vmem [resolvable:$true] %s14_s7 }
   0x3   :  { %s53_s8 = scalar_lea.vmem %s15_s7, 128  ;;  %p58_p1 = scmp.lt.s32.totalorder %s15_s7, %s15_s7 }
   0x4   :  { %p54_p0 = scmp.ne.s32.totalorder %s15_s7, %s53_s8  ;;  %p59_p2 = scmp.lt.s32.totalorder %s53_s8, %s53_s8 }
   0x6   :  { %p60_p3 = por %p59_p2, %p58_p1 }
   0x8   :  { %p61_p4 = pnand %p60_p3, %p54_p0 }
   0xa   :  { %64 = shalt.err (!%p61_p4)
}
   0xb   :  { %17 = dma.hbm_to_vmem [thread:$0]  %s109_s0, 128, %s15_s7, [#allocation3]  }
   0xc   :  { %85 = dma.done.wait [#allocation3], 128  }
   0xd   :  { %86 = vsyncadd [#allocation3], 4294967168  ;;  %s90_s11 = smov [#allocation5]   ;;  %v21_v0 = vld [vmem:[#allocation2] sm:$0xff] }
   0xe   :  { %s29_s12 = sshll.u32 %s90_s11, 4  ;;  %22 = vst [vmem:[#allocation5] sm:$0xff] %v21_v0  ;;  %23 = vst [vmem:[#allocation5 + $0x8] sm:$0xff] %v21_v0  ;;  %s30_s12 = int_to_ptr.vmem [resolvable:$true] %s29_s12 }
   0xf   :  { %s65_s13 = scalar_lea.vmem %s30_s12, 256  ;;  %p70_p6 = scmp.lt.s32.totalorder %s30_s12, %s30_s12 }
  0x10   :  { %p66_p5 = scmp.ne.s32.totalorder %s30_s12, %s65_s13  ;;  %p71_p7 = scmp.lt.s32.totalorder %s65_s13, %s65_s13 }
  0x12   :  { %p72_p8 = por %p71_p7, %p70_p6 }
  0x14   :  { %p73_p9 = pnand %p72_p8, %p66_p5 }
  0x16   :  { %76 = shalt.err (!%p73_p9)
}
  0x17   :  { %s91_s14 = smov 128   ;;  %s92_s15 = smov 8  }
  0x18   :  { %35 = dma.vmem_to_hbm [thread:$0]  %s30_s12, 256, %s110_s1, [#allocation4], %s91_s14, %s91_s14, %s92_s15  }
  0x19   :  { %87 = dma.done.wait [#allocation4], 256  }
  0x1a   :  { %88 = vsyncadd [#allocation4], 4294967040 }
  0x1b   :  { %39 = vsyncpa [#allocation3], 1 }
  0x1c   :  { %40 = vsyncpa [#allocation4], 1 }

</bundles_post_ra>
